<compile_context>
chip_gen: v6e
topology: v6e:2x2x1
jax: 0.10.0
libtpu: 0.0.40
codegen_flags: <defaults>
</compile_context>

<pallas_src>
import functools

import jax
import jax.numpy as jnp
import numpy as np
from jax.experimental import pallas as pl
from jax.experimental.pallas import tpu as pltpu


# --------------------------- fused kernel -------------------------------------
def fused_inverted_residual_kernel(
        x_ref,    # (Cin,  HW)    one image, channels on sublanes, H*W on lanes (f32)
        we_ref,   # (Chid, Cin)   1x1 expand weight, BN scale folded (bf16)
        be_ref,   # (Chid, 1)     expand BN bias (f32)
        mt_ref,   # (9, Chid, HW) depthwise taps pre-combined with boundary masks (f32)
        bdw_ref,  # (Chid, 1)     depthwise BN bias (f32)
        w1_ref,   # (Cr, Chid)    SE fc1 weight (bf16)
        b1_ref,   # (Cr, 1)       SE fc1 bias (f32)
        w2_ref,   # (Chid, Cr)    SE fc2 weight (f32)
        b2_ref,   # (Chid, 1)     SE fc2 bias (f32)
        wp_ref,   # (Coup, Chid)  1x1 project weight, BN scale folded (bf16)
        bp_ref,   # (Coup, 1)     project BN bias (f32)
        o_ref,    # (Coup, HW)    output (f32)
        *, H, W):
    HW = H * W
    x = x_ref[...]                                    # f32; kept exact for the residual

    # ---- 1x1 expand conv (+ folded BN) + h_swish ------------------------------
    h = jnp.dot(we_ref[...], x.astype(jnp.bfloat16),
                preferred_element_type=jnp.float32) + be_ref[...]
    h = h * (jnp.clip(h + 3.0, 0.0, 6.0) * (1.0 / 6.0))

    # ---- 3x3 depthwise conv, stride 1, pad 1 (+ folded BN) --------------------
    # out[c, hw] = sum_k (tap[c,k] * mask[k,hw]) * h[c, hw + s_k]   (zero outside image)
    acc = h * mt_ref[4]                               # centre tap (s = 0)
    for kh in range(3):
        for kw in range(3):
            k = kh * 3 + kw
            if k == 4:
                continue
            s = (kh - 1) * W + (kw - 1)               # flat source offset
            shifted = pltpu.roll(h, shift=(-s) % HW, axis=1)
            acc = acc + shifted * mt_ref[k]
    d = acc + bdw_ref[...]

    # ---- SE: (avg-pool + fc1) fused as a lane-dense matmul -> ReLU -> fc2 -----
    z = jnp.dot(w1_ref[...], d.astype(jnp.bfloat16),
                preferred_element_type=jnp.float32)                  # (Cr, HW)
    z = jnp.sum(z, axis=1, keepdims=True) * (1.0 / HW) + b1_ref[...]  # (Cr, 1)
    z = jnp.maximum(z, 0.0)
    y = jnp.dot(w2_ref[...], z, preferred_element_type=jnp.float32) + b2_ref[...]
    se = jnp.clip(y + 3.0, 0.0, 6.0) * (1.0 / 6.0)                   # (Chid, 1)
    d = d * se

    # ---- h_swish ----------------------------------------------------------------
    d = d * (jnp.clip(d + 3.0, 0.0, 6.0) * (1.0 / 6.0))

    # ---- 1x1 project conv (+ folded BN) + identity residual ----------------------
    out = jnp.dot(wp_ref[...], d.astype(jnp.bfloat16),
                  preferred_element_type=jnp.float32) + bp_ref[...]
    o_ref[...] = out + x


# ------------------------- parameter preparation (one-time) --------------------
def _fold_bn(gamma, beta, mean, var, eps=1e-5):
    scale = gamma / jnp.sqrt(var + eps)
    bias = beta - mean * scale
    return scale, bias


def _dw_boundary_masks(H, W):
    hh, ww = np.meshgrid(np.arange(H), np.arange(W), indexing="ij")
    hh = hh.reshape(-1)
    ww = ww.reshape(-1)
    masks = np.zeros((9, H * W), np.float32)
    for kh in range(3):
        for kw in range(3):
            dh, dw = kh - 1, kw - 1
            valid = ((hh + dh >= 0) & (hh + dh < H) &
                     (ww + dw >= 0) & (ww + dw < W))
            masks[kh * 3 + kw] = valid.astype(np.float32)
    return masks


def prepare_kernel_params(p, H, W):
    """Hoisted out of the per-forward jit: fold BN scales into conv weights,
    pre-combine depthwise taps with boundary masks, cast MXU weights to bf16."""
    s1, c1 = _fold_bn(*p["bn1"])      # expand BN    (Chid,)
    s2, c2 = _fold_bn(*p["bn2"])      # depthwise BN (Chid,)
    s3, c3 = _fold_bn(*p["bn3"])      # project BN   (Coup,)

    we = (p["w_exp"] * s1[:, None]).astype(jnp.bfloat16)     # (Chid, Cin)
    wp = (p["wp"] * s3[:, None]).astype(jnp.bfloat16)        # (Coup, Chid)
    w1 = p["w1"].astype(jnp.bfloat16)                        # (Cr, Chid)

    taps = (p["w_dw"] * s2[:, None, None]).reshape(-1, 9)    # (Chid, 9)
    masks = jnp.asarray(_dw_boundary_masks(H, W))            # (9, HW)
    mt = taps.T[:, :, None] * masks[:, None, :]              # (9, Chid, HW) f32

    col = lambda v: v[:, None].astype(jnp.float32)
    return dict(we=we, be=col(c1), mt=mt, bdw=col(c2),
                w1=w1, b1=col(p["b1"]),
                w2=p["w2"].astype(jnp.float32), b2=col(p["b2"]),
                wp=wp, bp=col(c3))


# ------------------------------- wrapper ---------------------------------------
def inverted_residual_forward(x_nchw, prep):
    B, Cin, H, W = x_nchw.shape
    HW = H * W
    Chid = prep["we"].shape[0]
    Cr = prep["w1"].shape[0]
    Coup = prep["wp"].shape[0]

    # NCHW -> (B, C, H*W): free reshape, H*W = 256 lands on the lane axis.
    x3d = x_nchw.reshape(B, Cin, HW).astype(jnp.float32)

    kernel = functools.partial(fused_inverted_residual_kernel, H=H, W=W)
    full2 = lambda b: (0, 0)           # weights: same block every grid step -> resident
    out3d = pl.pallas_call(
        kernel,
        out_shape=jax.ShapeDtypeStruct((B, Coup, HW), jnp.float32),
        grid=(B,),
        in_specs=[
            pl.BlockSpec((None, Cin, HW), lambda b: (b, 0, 0)),   # x: one image / step
            pl.BlockSpec((Chid, Cin), full2),                     # expand weight
            pl.BlockSpec((Chid, 1), full2),                       # expand BN bias
            pl.BlockSpec((9, Chid, HW), lambda b: (0, 0, 0)),     # masked dw taps
            pl.BlockSpec((Chid, 1), full2),                       # dw BN bias
            pl.BlockSpec((Cr, Chid), full2),                      # SE fc1 weight
            pl.BlockSpec((Cr, 1), full2),                         # SE fc1 bias
            pl.BlockSpec((Chid, Cr), full2),                      # SE fc2 weight
            pl.BlockSpec((Chid, 1), full2),                       # SE fc2 bias
            pl.BlockSpec((Coup, Chid), full2),                    # project weight
            pl.BlockSpec((Coup, 1), full2),                       # project BN bias
        ],
        out_specs=pl.BlockSpec((None, Coup, HW), lambda b: (b, 0, 0)),
        compiler_params=pltpu.CompilerParams(
            dimension_semantics=("parallel",)),                   # 2 TCs on v7x
    )(x3d, prep["we"], prep["be"], prep["mt"], prep["bdw"],
      prep["w1"], prep["b1"], prep["w2"], prep["b2"], prep["wp"], prep["bp"])

    return out3d.reshape(B, Coup, H, W)               # free reshape back to NCHW


# ------------------------ pure-JAX reference (NCHW, f32) -----------------------
def _hsig(x):
    return jnp.clip(x + 3.0, 0.0, 6.0) / 6.0


def _hswish(x):
    return x * _hsig(x)


def reference_nchw(x, p):
    B, Cin, H, W = x.shape
    s1, c1 = _fold_bn(*p["bn1"])
    s2, c2 = _fold_bn(*p["bn2"])
    s3, c3 = _fold_bn(*p["bn3"])

    h = jnp.einsum('oc,bchw->bohw', p["w_exp"], x)
    h = h * s1[None, :, None, None] + c1[None, :, None, None]
    h = _hswish(h)

    hp = jnp.pad(h, ((0, 0), (0, 0), (1, 1), (1, 1)))
    d = sum(hp[:, :, kh:kh + H, kw:kw + W] * p["w_dw"][None, :, kh, kw, None, None]
            for kh in range(3) for kw in range(3))
    d = d * s2[None, :, None, None] + c2[None, :, None, None]

    y = jnp.mean(d, axis=(2, 3))                       # (B, Chid)
    y = jnp.maximum(y @ p["w1"].T + p["b1"], 0.0)      # Linear(Chid -> Cr) + ReLU
    y = y @ p["w2"].T + p["b2"]                        # Linear(Cr -> Chid)
    y = _hsig(y)
    d = d * y[:, :, None, None]

    d = _hswish(d)
    out = jnp.einsum('oc,bchw->bohw', p["wp"], d)
    out = out * s3[None, :, None, None] + c3[None, :, None, None]
    return out + x                                     # identity residual


# ------------------------------ parameters -------------------------------------
def make_params(key, inp, hidden, oup, reduction=4):
    cr = max(hidden // reduction, 1)
    ks = jax.random.split(key, 10)

    def bn_stats(k, c):
        k1, k2, k3, k4 = jax.random.split(k, 4)
        gamma = jax.random.uniform(k1, (c,), jnp.float32, 0.5, 1.5)
        beta = 0.1 * jax.random.normal(k2, (c,), jnp.float32)
        mean = 0.1 * jax.random.normal(k3, (c,), jnp.float32)
        var = jax.random.uniform(k4, (c,), jnp.float32, 0.5, 1.5)
        return gamma, beta, mean, var

    return {
        # expand 1x1 conv: PyTorch weight (hidden, inp, 1, 1) -> (hidden, inp)
        "w_exp": 0.2 * jax.random.normal(ks[0], (hidden, inp), jnp.float32),
        "bn1": bn_stats(ks[1], hidden),
        # depthwise 3x3 conv: PyTorch weight (hidden, 1, 3, 3) -> (hidden, 3, 3)
        "w_dw": 0.2 * jax.random.normal(ks[2], (hidden, 3, 3), jnp.float32),
        "bn2": bn_stats(ks[3], hidden),
        # SE fc1: Linear(hidden, hidden//4), PyTorch weight (cr, hidden)
        "w1": 0.2 * jax.random.normal(ks[4], (cr, hidden), jnp.float32),
        "b1": 0.1 * jax.random.normal(ks[5], (cr,), jnp.float32),
        # SE fc2: Linear(hidden//4, hidden), PyTorch weight (hidden, cr)
        "w2": 0.2 * jax.random.normal(ks[6], (hidden, cr), jnp.float32),
        "b2": 0.1 * jax.random.normal(ks[7], (hidden,), jnp.float32),
        # project 1x1 conv: PyTorch weight (oup, hidden, 1, 1) -> (oup, hidden)
        "wp": 0.2 * jax.random.normal(ks[8], (oup, hidden), jnp.float32),
        "bn3": bn_stats(ks[9], oup),
    }


if __name__ == "__main__":
    # InvertedResidual(inp=4, hidden_dim=8, oup=4, kernel_size=3, stride=1,
    #                  use_se=True, use_hs=True)  -> identity residual branch.
    B, Cin, H, W = 2, 4, 16, 16
    hidden, Coup = 8, 4

    key = jax.random.PRNGKey(0)
    kx, kp = jax.random.split(key)
    x_nchw = jax.random.normal(kx, (B, Cin, H, W), jnp.float32)
    params = make_params(kp, Cin, hidden, Coup)

    # One-time weight prep (outside the jitted forward path).
    prep = prepare_kernel_params(params, H, W)

    fwd = jax.jit(inverted_residual_forward)
    out = jax.block_until_ready(fwd(x_nchw, prep))
    assert out.shape == (B, Coup, H, W)

    ref = reference_nchw(x_nchw, params)
    # Tolerance accounts for bf16 MXU operands (f32 accumulation) vs the pure-f32 reference.
    np.testing.assert_allclose(np.asarray(out), np.asarray(ref), rtol=3e-2, atol=3e-2)

    print("KERNEL_OK")
</pallas_src>

<mosaic_0001>
module attributes {stable_mosaic.version = 11 : i64} {
  func.func @fused_inverted_residual_kernel(%arg0: i32, %arg1: memref<1x4x256xf32, #tpu.memory_space<vmem>>, %arg2: memref<8x4xbf16, #tpu.memory_space<vmem>>, %arg3: memref<8x1xf32, #tpu.memory_space<vmem>>, %arg4: memref<9x8x256xf32, #tpu.memory_space<vmem>>, %arg5: memref<8x1xf32, #tpu.memory_space<vmem>>, %arg6: memref<2x8xbf16, #tpu.memory_space<vmem>>, %arg7: memref<2x1xf32, #tpu.memory_space<vmem>>, %arg8: memref<8x2xf32, #tpu.memory_space<vmem>>, %arg9: memref<8x1xf32, #tpu.memory_space<vmem>>, %arg10: memref<4x8xbf16, #tpu.memory_space<vmem>>, %arg11: memref<4x1xf32, #tpu.memory_space<vmem>>, %arg12: memref<1x4x256xf32, #tpu.memory_space<vmem>>) attributes {dimension_semantics = [#tpu.dimension_semantics<parallel>], iteration_bounds = array<i64: 2>, scalar_prefetch = 0 : i64, scratch_operands = 0 : i64, tpu.core_type = #tpu.core_type<tc>, window_params = [{transform_indices = @transform_0, window_bounds = array<i64: 1, 4, 256>}, {pipeline_mode = #tpu.pipeline_mode<synchronous>, transform_indices = @transform_1, window_bounds = array<i64: 8, 4>}, {pipeline_mode = #tpu.pipeline_mode<synchronous>, transform_indices = @transform_2, window_bounds = array<i64: 8, 1>}, {pipeline_mode = #tpu.pipeline_mode<synchronous>, transform_indices = @transform_3, window_bounds = array<i64: 9, 8, 256>}, {pipeline_mode = #tpu.pipeline_mode<synchronous>, transform_indices = @transform_4, window_bounds = array<i64: 8, 1>}, {pipeline_mode = #tpu.pipeline_mode<synchronous>, transform_indices = @transform_5, window_bounds = array<i64: 2, 8>}, {pipeline_mode = #tpu.pipeline_mode<synchronous>, transform_indices = @transform_6, window_bounds = array<i64: 2, 1>}, {pipeline_mode = #tpu.pipeline_mode<synchronous>, transform_indices = @transform_7, window_bounds = array<i64: 8, 2>}, {pipeline_mode = #tpu.pipeline_mode<synchronous>, transform_indices = @transform_8, window_bounds = array<i64: 8, 1>}, {pipeline_mode = #tpu.pipeline_mode<synchronous>, transform_indices = @transform_9, window_bounds = array<i64: 4, 8>}, {pipeline_mode = #tpu.pipeline_mode<synchronous>, transform_indices = @transform_10, window_bounds = array<i64: 4, 1>}, {transform_indices = @transform_11, window_bounds = array<i64: 1, 4, 256>}]} {
    %c0 = arith.constant 0 : index
    %c0_0 = arith.constant 0 : index
    %c0_1 = arith.constant 0 : index
    %0 = vector.load %arg1[%c0, %c0_0, %c0_1] : memref<1x4x256xf32, #tpu.memory_space<vmem>>, vector<1x4x256xf32>
    %1 = vector.shape_cast %0 : vector<1x4x256xf32> to vector<4x256xf32>
    %c0_2 = arith.constant 0 : index
    %c0_3 = arith.constant 0 : index
    %2 = vector.load %arg2[%c0_2, %c0_3] : memref<8x4xbf16, #tpu.memory_space<vmem>>, vector<8x4xbf16>
    %3 = arith.truncf %1 : vector<4x256xf32> to vector<4x256xbf16>
    %cst = arith.constant dense<0.000000e+00> : vector<8x256xf32>
    %4 = tpu.matmul %2, %3, %cst {dimension_numbers = #tpu.dot_dimension_numbers<[1], [0], [0], [1], [0, 0, 1, 1], [], []>} : vector<8x4xbf16>, vector<4x256xbf16>, vector<8x256xf32> -> vector<8x256xf32>
    %c0_4 = arith.constant 0 : index
    %c0_5 = arith.constant 0 : index
    %5 = vector.load %arg3[%c0_4, %c0_5] : memref<8x1xf32, #tpu.memory_space<vmem>>, vector<8x1xf32>
    %6 = vector.broadcast %5 : vector<8x1xf32> to vector<8x256xf32>
    %7 = arith.addf %4, %6 : vector<8x256xf32>
    %cst_6 = arith.constant 3.000000e+00 : f32
    %8 = vector.broadcast %cst_6 : f32 to vector<8x256xf32>
    %9 = arith.addf %7, %8 : vector<8x256xf32>
    %cst_7 = arith.constant 0.000000e+00 : f32
    %cst_8 = arith.constant 6.000000e+00 : f32
    %10 = vector.broadcast %cst_7 : f32 to vector<8x256xf32>
    %11 = arith.maximumf %10, %9 : vector<8x256xf32>
    %12 = vector.broadcast %cst_8 : f32 to vector<8x256xf32>
    %13 = arith.minimumf %12, %11 : vector<8x256xf32>
    %cst_9 = arith.constant 0.166666672 : f32
    %14 = vector.broadcast %cst_9 : f32 to vector<8x256xf32>
    %15 = arith.mulf %13, %14 : vector<8x256xf32>
    %16 = arith.mulf %7, %15 : vector<8x256xf32>
    %c4 = arith.constant 4 : index
    %c0_10 = arith.constant 0 : index
    %c0_11 = arith.constant 0 : index
    %17 = vector.load %arg4[%c4, %c0_10, %c0_11] : memref<9x8x256xf32, #tpu.memory_space<vmem>>, vector<1x8x256xf32>
    %18 = vector.shape_cast %17 : vector<1x8x256xf32> to vector<8x256xf32>
    %19 = arith.mulf %16, %18 : vector<8x256xf32>
    %c17_i32 = arith.constant 17 : i32
    %20 = tpu.dynamic_rotate %16 by %c17_i32 dim 1 : vector<8x256xf32>, i32 -> vector<8x256xf32>
    %c0_12 = arith.constant 0 : index
    %c0_13 = arith.constant 0 : index
    %c0_14 = arith.constant 0 : index
    %21 = vector.load %arg4[%c0_12, %c0_13, %c0_14] : memref<9x8x256xf32, #tpu.memory_space<vmem>>, vector<1x8x256xf32>
    %22 = vector.shape_cast %21 : vector<1x8x256xf32> to vector<8x256xf32>
    %23 = arith.mulf %20, %22 : vector<8x256xf32>
    %24 = arith.addf %19, %23 : vector<8x256xf32>
    %c16_i32 = arith.constant 16 : i32
    %25 = tpu.dynamic_rotate %16 by %c16_i32 dim 1 : vector<8x256xf32>, i32 -> vector<8x256xf32>
    %c1 = arith.constant 1 : index
    %c0_15 = arith.constant 0 : index
    %c0_16 = arith.constant 0 : index
    %26 = vector.load %arg4[%c1, %c0_15, %c0_16] : memref<9x8x256xf32, #tpu.memory_space<vmem>>, vector<1x8x256xf32>
    %27 = vector.shape_cast %26 : vector<1x8x256xf32> to vector<8x256xf32>
    %28 = arith.mulf %25, %27 : vector<8x256xf32>
    %29 = arith.addf %24, %28 : vector<8x256xf32>
    %c15_i32 = arith.constant 15 : i32
    %30 = tpu.dynamic_rotate %16 by %c15_i32 dim 1 : vector<8x256xf32>, i32 -> vector<8x256xf32>
    %c2 = arith.constant 2 : index
    %c0_17 = arith.constant 0 : index
    %c0_18 = arith.constant 0 : index
    %31 = vector.load %arg4[%c2, %c0_17, %c0_18] : memref<9x8x256xf32, #tpu.memory_space<vmem>>, vector<1x8x256xf32>
    %32 = vector.shape_cast %31 : vector<1x8x256xf32> to vector<8x256xf32>
    %33 = arith.mulf %30, %32 : vector<8x256xf32>
    %34 = arith.addf %29, %33 : vector<8x256xf32>
    %c1_i32 = arith.constant 1 : i32
    %35 = tpu.dynamic_rotate %16 by %c1_i32 dim 1 : vector<8x256xf32>, i32 -> vector<8x256xf32>
    %c3 = arith.constant 3 : index
    %c0_19 = arith.constant 0 : index
    %c0_20 = arith.constant 0 : index
    %36 = vector.load %arg4[%c3, %c0_19, %c0_20] : memref<9x8x256xf32, #tpu.memory_space<vmem>>, vector<1x8x256xf32>
    %37 = vector.shape_cast %36 : vector<1x8x256xf32> to vector<8x256xf32>
    %38 = arith.mulf %35, %37 : vector<8x256xf32>
    %39 = arith.addf %34, %38 : vector<8x256xf32>
    %c255_i32 = arith.constant 255 : i32
    %40 = tpu.dynamic_rotate %16 by %c255_i32 dim 1 : vector<8x256xf32>, i32 -> vector<8x256xf32>
    %c5 = arith.constant 5 : index
    %c0_21 = arith.constant 0 : index
    %c0_22 = arith.constant 0 : index
    %41 = vector.load %arg4[%c5, %c0_21, %c0_22] : memref<9x8x256xf32, #tpu.memory_space<vmem>>, vector<1x8x256xf32>
    %42 = vector.shape_cast %41 : vector<1x8x256xf32> to vector<8x256xf32>
    %43 = arith.mulf %40, %42 : vector<8x256xf32>
    %44 = arith.addf %39, %43 : vector<8x256xf32>
    %c241_i32 = arith.constant 241 : i32
    %45 = tpu.dynamic_rotate %16 by %c241_i32 dim 1 : vector<8x256xf32>, i32 -> vector<8x256xf32>
    %c6 = arith.constant 6 : index
    %c0_23 = arith.constant 0 : index
    %c0_24 = arith.constant 0 : index
    %46 = vector.load %arg4[%c6, %c0_23, %c0_24] : memref<9x8x256xf32, #tpu.memory_space<vmem>>, vector<1x8x256xf32>
    %47 = vector.shape_cast %46 : vector<1x8x256xf32> to vector<8x256xf32>
    %48 = arith.mulf %45, %47 : vector<8x256xf32>
    %49 = arith.addf %44, %48 : vector<8x256xf32>
    %c240_i32 = arith.constant 240 : i32
    %50 = tpu.dynamic_rotate %16 by %c240_i32 dim 1 : vector<8x256xf32>, i32 -> vector<8x256xf32>
    %c7 = arith.constant 7 : index
    %c0_25 = arith.constant 0 : index
    %c0_26 = arith.constant 0 : index
    %51 = vector.load %arg4[%c7, %c0_25, %c0_26] : memref<9x8x256xf32, #tpu.memory_space<vmem>>, vector<1x8x256xf32>
    %52 = vector.shape_cast %51 : vector<1x8x256xf32> to vector<8x256xf32>
    %53 = arith.mulf %50, %52 : vector<8x256xf32>
    %54 = arith.addf %49, %53 : vector<8x256xf32>
    %c239_i32 = arith.constant 239 : i32
    %55 = tpu.dynamic_rotate %16 by %c239_i32 dim 1 : vector<8x256xf32>, i32 -> vector<8x256xf32>
    %c8 = arith.constant 8 : index
    %c0_27 = arith.constant 0 : index
    %c0_28 = arith.constant 0 : index
    %56 = vector.load %arg4[%c8, %c0_27, %c0_28] : memref<9x8x256xf32, #tpu.memory_space<vmem>>, vector<1x8x256xf32>
    %57 = vector.shape_cast %56 : vector<1x8x256xf32> to vector<8x256xf32>
    %58 = arith.mulf %55, %57 : vector<8x256xf32>
    %59 = arith.addf %54, %58 : vector<8x256xf32>
    %c0_29 = arith.constant 0 : index
    %c0_30 = arith.constant 0 : index
    %60 = vector.load %arg5[%c0_29, %c0_30] : memref<8x1xf32, #tpu.memory_space<vmem>>, vector<8x1xf32>
    %61 = vector.broadcast %60 : vector<8x1xf32> to vector<8x256xf32>
    %62 = arith.addf %59, %61 : vector<8x256xf32>
    %c0_31 = arith.constant 0 : index
    %c0_32 = arith.constant 0 : index
    %63 = vector.load %arg6[%c0_31, %c0_32] : memref<2x8xbf16, #tpu.memory_space<vmem>>, vector<2x8xbf16>
    %64 = arith.truncf %62 : vector<8x256xf32> to vector<8x256xbf16>
    %cst_33 = arith.constant dense<0.000000e+00> : vector<2x256xf32>
    %65 = tpu.matmul %63, %64, %cst_33 {dimension_numbers = #tpu.dot_dimension_numbers<[1], [0], [0], [1], [0, 0, 1, 1], [], []>} : vector<2x8xbf16>, vector<8x256xbf16>, vector<2x256xf32> -> vector<2x256xf32>
    %cst_34 = arith.constant dense<0.000000e+00> : vector<2xf32>
    %66 = vector.multi_reduction <add>, %65, %cst_34 [1] : vector<2x256xf32> to vector<2xf32>
    %67 = vector.shape_cast %66 : vector<2xf32> to vector<2x1xf32>
    %cst_35 = arith.constant 3.906250e-03 : f32
    %68 = vector.broadcast %cst_35 : f32 to vector<2x1xf32>
    %69 = arith.mulf %67, %68 : vector<2x1xf32>
    %c0_36 = arith.constant 0 : index
    %c0_37 = arith.constant 0 : index
    %70 = vector.load %arg7[%c0_36, %c0_37] : memref<2x1xf32, #tpu.memory_space<vmem>>, vector<2x1xf32>
    %71 = arith.addf %69, %70 : vector<2x1xf32>
    %cst_38 = arith.constant 0.000000e+00 : f32
    %72 = vector.broadcast %cst_38 : f32 to vector<2x1xf32>
    %73 = arith.maximumf %71, %72 : vector<2x1xf32>
    %c0_39 = arith.constant 0 : index
    %c0_40 = arith.constant 0 : index
    %74 = vector.load %arg8[%c0_39, %c0_40] : memref<8x2xf32, #tpu.memory_space<vmem>>, vector<8x2xf32>
    %cst_41 = arith.constant dense<0.000000e+00> : vector<8x1xf32>
    %75 = tpu.matmul %74, %73, %cst_41 {dimension_numbers = #tpu.dot_dimension_numbers<[1], [0], [0], [1], [0, 0, 1, 1], [], []>} : vector<8x2xf32>, vector<2x1xf32>, vector<8x1xf32> -> vector<8x1xf32>
    %c0_42 = arith.constant 0 : index
    %c0_43 = arith.constant 0 : index
    %76 = vector.load %arg9[%c0_42, %c0_43] : memref<8x1xf32, #tpu.memory_space<vmem>>, vector<8x1xf32>
    %77 = arith.addf %75, %76 : vector<8x1xf32>
    %cst_44 = arith.constant 3.000000e+00 : f32
    %78 = vector.broadcast %cst_44 : f32 to vector<8x1xf32>
    %79 = arith.addf %77, %78 : vector<8x1xf32>
    %cst_45 = arith.constant 0.000000e+00 : f32
    %cst_46 = arith.constant 6.000000e+00 : f32
    %80 = vector.broadcast %cst_45 : f32 to vector<8x1xf32>
    %81 = arith.maximumf %80, %79 : vector<8x1xf32>
    %82 = vector.broadcast %cst_46 : f32 to vector<8x1xf32>
    %83 = arith.minimumf %82, %81 : vector<8x1xf32>
    %cst_47 = arith.constant 0.166666672 : f32
    %84 = vector.broadcast %cst_47 : f32 to vector<8x1xf32>
    %85 = arith.mulf %83, %84 : vector<8x1xf32>
    %86 = vector.broadcast %85 : vector<8x1xf32> to vector<8x256xf32>
    %87 = arith.mulf %62, %86 : vector<8x256xf32>
    %cst_48 = arith.constant 3.000000e+00 : f32
    %88 = vector.broadcast %cst_48 : f32 to vector<8x256xf32>
    %89 = arith.addf %87, %88 : vector<8x256xf32>
    %cst_49 = arith.constant 0.000000e+00 : f32
    %cst_50 = arith.constant 6.000000e+00 : f32
    %90 = vector.broadcast %cst_49 : f32 to vector<8x256xf32>
    %91 = arith.maximumf %90, %89 : vector<8x256xf32>
    %92 = vector.broadcast %cst_50 : f32 to vector<8x256xf32>
    %93 = arith.minimumf %92, %91 : vector<8x256xf32>
    %cst_51 = arith.constant 0.166666672 : f32
    %94 = vector.broadcast %cst_51 : f32 to vector<8x256xf32>
    %95 = arith.mulf %93, %94 : vector<8x256xf32>
    %96 = arith.mulf %87, %95 : vector<8x256xf32>
    %c0_52 = arith.constant 0 : index
    %c0_53 = arith.constant 0 : index
    %97 = vector.load %arg10[%c0_52, %c0_53] : memref<4x8xbf16, #tpu.memory_space<vmem>>, vector<4x8xbf16>
    %98 = arith.truncf %96 : vector<8x256xf32> to vector<8x256xbf16>
    %cst_54 = arith.constant dense<0.000000e+00> : vector<4x256xf32>
    %99 = tpu.matmul %97, %98, %cst_54 {dimension_numbers = #tpu.dot_dimension_numbers<[1], [0], [0], [1], [0, 0, 1, 1], [], []>} : vector<4x8xbf16>, vector<8x256xbf16>, vector<4x256xf32> -> vector<4x256xf32>
    %c0_55 = arith.constant 0 : index
    %c0_56 = arith.constant 0 : index
    %100 = vector.load %arg11[%c0_55, %c0_56] : memref<4x1xf32, #tpu.memory_space<vmem>>, vector<4x1xf32>
    %101 = vector.broadcast %100 : vector<4x1xf32> to vector<4x256xf32>
    %102 = arith.addf %99, %101 : vector<4x256xf32>
    %103 = arith.addf %102, %1 : vector<4x256xf32>
    %c0_57 = arith.constant 0 : index
    %c0_58 = arith.constant 0 : index
    %c0_59 = arith.constant 0 : index
    %104 = vector.load %arg12[%c0_57, %c0_58, %c0_59] : memref<1x4x256xf32, #tpu.memory_space<vmem>>, vector<1x4x256xf32>
    %105 = vector.shape_cast %104 : vector<1x4x256xf32> to vector<4x256xf32>
    %106 = vector.shape_cast %103 : vector<4x256xf32> to vector<1x4x256xf32>
    tpu.vector_store %arg12[%c0_57, %c0_58, %c0_59], %106 {strides = array<i32>} : memref<1x4x256xf32, #tpu.memory_space<vmem>>, vector<1x4x256xf32>,
    return
  }
  func.func @transform_0(%arg0: i32) -> (i32, i32, i32) {
    %c0_i32 = arith.constant 0 : i32
    %c0_i32_0 = arith.constant 0 : i32
    %c0_i32_1 = arith.constant 0 : i32
    return %arg0, %c0_i32, %c0_i32_0 : i32, i32, i32
  }
  func.func @transform_1(%arg0: i32) -> (i32, i32) {
    %c0_i32 = arith.constant 0 : i32
    %c0_i32_0 = arith.constant 0 : i32
    %c0_i32_1 = arith.constant 0 : i32
    return %c0_i32, %c0_i32_0 : i32, i32
  }
  func.func @transform_2(%arg0: i32) -> (i32, i32) {
    %c0_i32 = arith.constant 0 : i32
    %c0_i32_0 = arith.constant 0 : i32
    %c0_i32_1 = arith.constant 0 : i32
    return %c0_i32, %c0_i32_0 : i32, i32
  }
  func.func @transform_3(%arg0: i32) -> (i32, i32, i32) {
    %c0_i32 = arith.constant 0 : i32
    %c0_i32_0 = arith.constant 0 : i32
    %c0_i32_1 = arith.constant 0 : i32
    %c0_i32_2 = arith.constant 0 : i32
    return %c0_i32, %c0_i32_0, %c0_i32_1 : i32, i32, i32
  }
  func.func @transform_4(%arg0: i32) -> (i32, i32) {
    %c0_i32 = arith.constant 0 : i32
    %c0_i32_0 = arith.constant 0 : i32
    %c0_i32_1 = arith.constant 0 : i32
    return %c0_i32, %c0_i32_0 : i32, i32
  }
  func.func @transform_5(%arg0: i32) -> (i32, i32) {
    %c0_i32 = arith.constant 0 : i32
    %c0_i32_0 = arith.constant 0 : i32
    %c0_i32_1 = arith.constant 0 : i32
    return %c0_i32, %c0_i32_0 : i32, i32
  }
  func.func @transform_6(%arg0: i32) -> (i32, i32) {
    %c0_i32 = arith.constant 0 : i32
    %c0_i32_0 = arith.constant 0 : i32
    %c0_i32_1 = arith.constant 0 : i32
    return %c0_i32, %c0_i32_0 : i32, i32
  }
  func.func @transform_7(%arg0: i32) -> (i32, i32) {
    %c0_i32 = arith.constant 0 : i32
    %c0_i32_0 = arith.constant 0 : i32
    %c0_i32_1 = arith.constant 0 : i32
    return %c0_i32, %c0_i32_0 : i32, i32
  }
  func.func @transform_8(%arg0: i32) -> (i32, i32) {
    %c0_i32 = arith.constant 0 : i32
    %c0_i32_0 = arith.constant 0 : i32
    %c0_i32_1 = arith.constant 0 : i32
    return %c0_i32, %c0_i32_0 : i32, i32
  }
  func.func @transform_9(%arg0: i32) -> (i32, i32) {
    %c0_i32 = arith.constant 0 : i32
    %c0_i32_0 = arith.constant 0 : i32
    %c0_i32_1 = arith.constant 0 : i32
    return %c0_i32, %c0_i32_0 : i32, i32
  }
  func.func @transform_10(%arg0: i32) -> (i32, i32) {
    %c0_i32 = arith.constant 0 : i32
    %c0_i32_0 = arith.constant 0 : i32
    %c0_i32_1 = arith.constant 0 : i32
    return %c0_i32, %c0_i32_0 : i32, i32
  }
  func.func @transform_11(%arg0: i32) -> (i32, i32, i32) {
    %c0_i32 = arith.constant 0 : i32
    %c0_i32_0 = arith.constant 0 : i32
    %c0_i32_1 = arith.constant 0 : i32
    return %arg0, %c0_i32, %c0_i32_0 : i32, i32, i32
  }
}

</mosaic_0001>

<bundles_post_ra>
// kernel: inverted_residual_forward.1
= control target key start
LH: loop header
LB: loop body
LE: loop exit
PB: predicated region body
PF: predicated region fallthrough
CT: control target
= control target key end

     0   :  { %s1019_s17 = smov 0   ;;  %s1174_s0 = inlined_call_operand.vmem [shape: f32[2,4,256], index: 0, kind: input, shape index: {}]   ;;  %s1175_s1 = inlined_call_operand.vmem [shape: bf16[8,4], index: 1, kind: input, shape index: {}]   ;;  %s1176_s2 = inlined_call_operand.vmem [shape: f32[8,1], index: 2, kind: input, shape index: {}]   ;;  %s1177_s3 = inlined_call_operand.vmem [shape: f32[9,8,256], index: 3, kind: input, shape index: {}]   ;;  %s1178_s4 = inlined_call_operand.vmem [shape: f32[8,1], index: 4, kind: input, shape index: {}]   ;;  %s1179_s5 = inlined_call_operand.vmem [shape: bf16[2,8], index: 5, kind: input, shape index: {}]   ;;  %s1180_s6 = inlined_call_operand.vmem [shape: f32[2,1], index: 6, kind: input, shape index: {}]   ;;  %s1181_s7 = inlined_call_operand.vmem [shape: f32[8,2], index: 7, kind: input, shape index: {}]   ;;  %s1182_s8 = inlined_call_operand.vmem [shape: f32[8,1], index: 8, kind: input, shape index: {}]   ;;  %s1183_s9 = inlined_call_operand.vmem [shape: bf16[4,8], index: 9, kind: input, shape index: {}]   ;;  %s1184_s10 = inlined_call_operand.vmem [shape: f32[4,1], index: 10, kind: input, shape index: {}]   ;;  %s1185_s11 = inlined_call_operand.vmem [shape: f32[2,4,256], index: 11, kind: output, shape index: {}]  }
   0x1 LB: > { %s874_s18 = sadd.s32 4294967295, %s946_s17   ;;  %p878_p0 = scmp.ge.s32.totalorder %s946_s17, 1  ;;  %s946_s17 = sphi %s1019_s17, %s21_s17  }
   0x2   : > { %p337_p1 = scmp.lt.s32.totalorder %s946_s17, 3 }
   0x4   : > { %p338_p2 = pnand %p878_p0, %p337_p1 }
   0x5   : > { %p377_p3 = scmp.lt.s32.totalorder (!%p338_p2), %s874_s18, 1  ;;  %s949_s27 = smov (!%p338_p2), 16  }
   0x6   : > { %341 = sbr.rel (%p338_p2) target bundleno = 1282 (0x502), region = 64  ;;  %s950_s28 = smov (!%p338_p2), 17  }
   0x7   : > { %s951_s29 = smov (!%p338_p2), 15   ;;  %s952_s30 = smov (!%p338_p2), 1  }
   0x8   : > { %s953_s12 = smov (!%p338_p2), 127   ;;  %s954_s13 = smov (!%p338_p2), 113  }
   0x9   : > { %s955_s14 = smov (!%p338_p2), 112   ;;  %s956_s15 = smov (!%p338_p2), 111  }
   0xb   : > { %v948_v0 = vmov 0   ;;  %v395_v1 = vld [vmem:[%s1176_s2] sm:$0xff]  ;;  %s1187_s18 = smov (!%p377_p3, %s874_s18), 1  ;;  %vm405_vm0 = vcmask 1041408   ;;  %vm401_vm1 = vcmask 31744   ;;  %v472_v30 = vlaneseq  ;;  %v886_v37 = vld [vmem:[%s1177_s3 + $0x48] sm:$0xff] }
   0xc   : > { %444 = vmatprep.mubr.bf16.mxu0 %v948_v0  ;;  %937 = vset.pattern.permute.xlu0 %v948_v0  ;;  %s909_s21 = sshll.u32 %s1187_s18, 3  ;;  %v389_v7 = vld [vmem:[%s1175_s1] sm:$0xf]  ;;  %v478_v39 = vld [vmem:[%s1177_s3 + $0x8] sm:$0xff]  ;;  %v887_v42 = vld [vmem:[%s1177_s3 + $0x10] sm:$0xff]  ;;  %vm596_vm10 = vcmask 1043456  }
   0xd   : > { %398 = vperm.xlu0 %937, %v395_v1   ;;  %938 = vset.pattern.permute.xlu1 %v948_v0  ;;  %s381_s24 = scalar_lea.vmem %s1174_s0, %s909_s21  ;;  %v581_v25 = vld [vmem:[%s1178_s4] sm:$0xff]  ;;  %v1060_v33 = vand.u32 127, %v472_v30  ;;  %v888_v43 = vld [vmem:[%s1177_s3 + $0x18] sm:$0xff]  ;;  %v890_v53 = vld [vmem:[%s1177_s3 + $0x28] sm:$0xff]  ;;  %vm592_vm11 = vcmask 64512   ;;  %vm958_vm12 = vmmov 0   ;;  %s386_s23 = scalar_lea.vmem %s1185_s11, %s909_s21 }
   0xe   : > { %635 = vmatprep.mubr.bf16.mxu1 %v948_v0  ;;  %v1042_v2 = vld [vmem:[%s381_s24] sm:$0xff]  ;;  %v891_v62 = vld [vmem:[%s1177_s3 + $0x30] sm:$0xff]  ;;  %v892_v63 = vld [vmem:[%s1177_s3 + $0x38] sm:$0xff]  ;;  %vm655_vm13 = vcmask 15360  }
   0xf   : > { %v1046_v3 = vcombine.high %v1042_v2, %v1042_v2  ;;  %v393_v4 = vpack.c.bf16 %v1042_v2, %v1042_v2  ;;  %vm487_vm2 = vcmp.lt.s32.totalorder %v1060_v33, 16  ;;  %v885_v36 = vld [vmem:[%s1177_s3 + $0x40] sm:$0xff]  ;;  %vm474_vm3 = vcmp.lt.s32.totalorder %v1060_v33, 17 }
  0x10   : > { %v477_v38 = vld [vmem:[%s1177_s3] sm:$0xff]  ;;  %vm501_vm4 = vcmp.lt.s32.totalorder %v1060_v33, 15  ;;  %vm515_vm5 = vcmp.lt.s32.totalorder %v1060_v33, 1  ;;  %vm529_vm6 = vcmp.lt.s32.totalorder %v1060_v33, 127  ;;  %vm543_vm7 = vcmp.lt.s32.totalorder %v1060_v33, 113 }
  0x11   : > { %v394_v5 = vpack.c.bf16 %v1046_v3, %v1046_v3  ;;  %v407_v6 = vsel %vm405_vm0, %v393_v4, 0  ;;  %v889_v52 = vld [vmem:[%s1177_s3 + $0x20] sm:$0xff]  ;;  %vm557_vm8 = vcmp.lt.s32.totalorder %v1060_v33, 112  ;;  %vm571_vm9 = vcmp.lt.s32.totalorder %v1060_v33, 111 }
  0x13   : > { %883 = vmatprep.subr.msk.bf16.mxu0 %vm405_vm0, %v394_v5 }
  0x14   : > { %427 = vmatpush1.bf16.msra.mxu0 %v407_v6 }
  0x17   : > { %884 = vmatmul.mubr.msk.bf16.vlgmr.msra.gmra.mxu0 %vm401_vm1, %v389_v7 }
  0x88   : > { %v399_v8 = vpop.permute.xlu0 %398 }
  0xd7   : > { %v446_v9 = vpop.f32.mrf.mxu0 }
  0xd8   : > { %v447_v10 = vadd.f32 %v446_v9, %v399_v8  ;;  %v893_v9 = vld [vmem:[%s1177_s3 + $0x50] sm:$0xff] }
  0xd9   : > { %v448_v11 = vpop.f32.mrf.mxu0 }
  0xda   : > { %v453_v12 = vadd.f32 3.0, %v447_v10  ;;  %v449_v13 = vadd.f32 %v448_v11, %v399_v8 }
  0xdb   : > { %v450_v14 = vpop.f32.mrf.mxu0 }
  0xdc   : > { %v455_v15 = vmax.f32 %v453_v12, 0.0  ;;  %v454_v16 = vadd.f32 3.0, %v449_v13 }
  0xdd   : > { %v451_v17 = vpop.f32.mrf.mxu0 }
  0xde   : > { %v457_v18 = vmin.f32 %v455_v15, 6.0  ;;  %v456_v19 = vmax.f32 %v454_v16, 0.0 }
  0xe0   : > { %v459_v20 = vmul.f32 0.16666667, %v457_v18  ;;  %v458_v21 = vmin.f32 %v456_v19, 6.0 }
  0xe2   : > { %v461_v22 = vmul.f32 %v459_v20, %v447_v10  ;;  %v460_v23 = vmul.f32 0.16666667, %v458_v21  ;;  %v894_v10 = vld [vmem:[%s1177_s3 + $0x58] sm:$0xff] }
  0xe4   : > { %483 = vrot.lane.b32.xlu1 %v461_v22, %s949_s27  ;;  %468 = vrot.lane.b32.xlu0 %v461_v22, %s950_s28  ;;  %v462_v24 = vmul.f32 %v460_v23, %v449_v13  ;;  %v466_v49 = vmul.f32 %v885_v36, %v461_v22  ;;  %v895_v23 = vld [vmem:[%s1177_s3 + $0x60] sm:$0xff] }
  0xe6   : > { %v467_v48 = vmul.f32 %v886_v37, %v462_v24 }
  0xe8   : > { %497 = vrot.lane.b32.xlu1 %v461_v22, %s951_s29  ;;  %485 = vrot.lane.b32.xlu0 %v462_v24, %s949_s27 }
  0xec   : > { %511 = vrot.lane.b32.xlu1 %v461_v22, %s952_s30  ;;  %499 = vrot.lane.b32.xlu0 %v462_v24, %s951_s29 }
  0xf0   : > { %525 = vrot.lane.b32.xlu1 %v461_v22, %s953_s12  ;;  %513 = vrot.lane.b32.xlu0 %v462_v24, %s952_s30 }
  0xf4   : > { %470 = vrot.lane.b32.xlu1 %v462_v24, %s950_s28  ;;  %527 = vrot.lane.b32.xlu0 %v462_v24, %s953_s12 }
  0xf8   : > { %539 = vrot.lane.b32.xlu1 %v461_v22, %s954_s13  ;;  %541 = vrot.lane.b32.xlu0 %v462_v24, %s954_s13 }
  0xfc   : > { %553 = vrot.lane.b32.xlu1 %v461_v22, %s955_s14  ;;  %555 = vrot.lane.b32.xlu0 %v462_v24, %s955_s14 }
 0x100   : > { %567 = vrot.lane.b32.xlu1 %v461_v22, %s956_s15  ;;  %569 = vrot.lane.b32.xlu0 %v462_v24, %s956_s15  ;;  %v896_v24 = vld [vmem:[%s1177_s3 + $0x68] sm:$0xff] }
 0x104   : > { %584 = vperm.xlu1 %938, %v581_v25  }
 0x156   : > { %v484_v26 = vpop.permute.xlu1 %483  ;;  %v469_v27 = vpop.permute.xlu0 %468 }
 0x15a   : > { %v498_v28 = vpop.permute.xlu1 %497  ;;  %v486_v29 = vpop.permute.xlu0 %485 }
 0x15b   : > { %v488_v44 = vsel %vm487_vm2, %v484_v26, %v486_v29  ;;  %v489_v45 = vsel %vm487_vm2, %v486_v29, %v484_v26 }
 0x15c   : > { %v493_v56 = vmul.f32 %v887_v42, %v489_v45  ;;  %v494_v57 = vmul.f32 %v888_v43, %v488_v44  ;;  %v899_v42 = vld [vmem:[%s1177_s3 + $0x80] sm:$0xff]  ;;  %v900_v43 = vld [vmem:[%s1177_s3 + $0x88] sm:$0xff] }
 0x15e   : > { %v512_v31 = vpop.permute.xlu1 %511  ;;  %v500_v32 = vpop.permute.xlu0 %499 }
 0x15f   : > { %v502_v54 = vsel %vm501_vm4, %v498_v28, %v500_v32  ;;  %v503_v55 = vsel %vm501_vm4, %v500_v32, %v498_v28  ;;  %v898_v32 = vld [vmem:[%s1177_s3 + $0x78] sm:$0xff] }
 0x160   : > { %v507_v5 = vmul.f32 %v889_v52, %v503_v55  ;;  %v508_v6 = vmul.f32 %v890_v53, %v502_v54 }
 0x162   : > { %v526_v34 = vpop.permute.xlu1 %525  ;;  %v514_v35 = vpop.permute.xlu0 %513 }
 0x163   : > { %v516_v1 = vsel %vm515_vm5, %v512_v31, %v514_v35  ;;  %v517_v4 = vsel %vm515_vm5, %v514_v35, %v512_v31  ;;  %v897_v31 = vld [vmem:[%s1177_s3 + $0x70] sm:$0xff] }
 0x164   : > { %v521_v13 = vmul.f32 %v891_v62, %v517_v4  ;;  %v522_v14 = vmul.f32 %v892_v63, %v516_v1  ;;  %v957_v4 = vmov 0.0  }
 0x165   : > { %913 = vmatprep.subr.mxu0 %v957_v4  ;;  %915 = vmatprep.mubr.msk.f32.mxu0 %vm958_vm12, %v957_v4 }
 0x166   : > { %v471_v40 = vpop.permute.xlu1 %470  ;;  %v528_v41 = vpop.permute.xlu0 %527 }
 0x167   : > { %v475_v46 = vsel %vm474_vm3, %v469_v27, %v471_v40  ;;  %v476_v47 = vsel %vm474_vm3, %v471_v40, %v469_v27  ;;  %v530_v11 = vsel %vm529_vm6, %v526_v34, %v528_v41  ;;  %v531_v12 = vsel %vm529_vm6, %v528_v41, %v526_v34 }
 0x168   : > { %v479_v50 = vmul.f32 %v477_v38, %v476_v47  ;;  %v480_v51 = vmul.f32 %v478_v39, %v475_v46  ;;  %v535_v19 = vmul.f32 %v893_v9, %v530_v11  ;;  %v536_v20 = vmul.f32 %v894_v10, %v531_v12  ;;  %v653_v9 = vld [vmem:[%s1181_s7] sm:$0xff] }
 0x169   : > { %v654_v10 = vld [vmem:[%s1182_s8] sm:$0xff] }
 0x16a   : > { %v481_v58 = vadd.f32 %v479_v50, %v466_v49  ;;  %v482_v59 = vadd.f32 %v480_v51, %v467_v48  ;;  %v540_v60 = vpop.permute.xlu1 %539  ;;  %v542_v61 = vpop.permute.xlu0 %541 }
 0x16b   : > { %v544_v25 = vsel %vm543_vm7, %v540_v60, %v542_v61  ;;  %v545_v26 = vsel %vm543_vm7, %v542_v61, %v540_v60 }
 0x16c   : > { %v495_v7 = vadd.f32 %v493_v56, %v481_v58  ;;  %v496_v8 = vadd.f32 %v494_v57, %v482_v59  ;;  %v549_v29 = vmul.f32 %v895_v23, %v544_v25  ;;  %v550_v30 = vmul.f32 %v896_v24, %v545_v26  ;;  %v589_v57 = vld [vmem:[%s1179_s5] sm:$0x1] }
 0x16e   : > { %v510_v15 = vadd.f32 %v508_v6, %v496_v8  ;;  %v509_v16 = vadd.f32 %v507_v5, %v495_v7  ;;  %v554_v21 = vpop.permute.xlu1 %553  ;;  %v556_v22 = vpop.permute.xlu0 %555  ;;  %v650_v5 = vld [vmem:[%s1180_s6] sm:$0x3] }
 0x16f   : > { %v558_v34 = vsel %vm557_vm8, %v554_v21, %v556_v22  ;;  %v559_v35 = vsel %vm557_vm8, %v556_v22, %v554_v21 }
 0x170   : > { %v524_v17 = vadd.f32 %v522_v14, %v510_v15  ;;  %v523_v18 = vadd.f32 %v521_v13, %v509_v16  ;;  %v563_v40 = vmul.f32 %v897_v31, %v558_v34  ;;  %v564_v41 = vmul.f32 %v898_v32, %v559_v35 }
 0x172   : > { %v537_v27 = vadd.f32 %v535_v19, %v523_v18  ;;  %v538_v28 = vadd.f32 %v536_v20, %v524_v17  ;;  %v568_v38 = vpop.permute.xlu1 %567  ;;  %v570_v39 = vpop.permute.xlu0 %569  ;;  %v756_v18 = vld [vmem:[%s1184_s10] sm:$0xf] }
 0x173   : > { %v572_v44 = vsel %vm571_vm9, %v568_v38, %v570_v39  ;;  %v573_v45 = vsel %vm571_vm9, %v570_v39, %v568_v38 }
 0x174   : > { %v551_v36 = vadd.f32 %v549_v29, %v537_v27  ;;  %v552_v37 = vadd.f32 %v550_v30, %v538_v28  ;;  %v577_v48 = vmul.f32 %v899_v42, %v572_v44  ;;  %v578_v49 = vmul.f32 %v900_v43, %v573_v45 }
 0x176   : > { %v565_v46 = vadd.f32 %v563_v40, %v551_v36  ;;  %v566_v47 = vadd.f32 %v564_v41, %v552_v37  ;;  %v753_v36 = vld [vmem:[%s1183_s9] sm:$0x3] }
 0x178   : > { %v579_v50 = vadd.f32 %v577_v48, %v565_v46  ;;  %v580_v51 = vadd.f32 %v578_v49, %v566_v47 }
 0x17f   : > { %v585_v33 = vpop.permute.xlu1 %584 }
 0x180   : > { %v587_v52 = vadd.f32 %v585_v33, %v579_v50  ;;  %v588_v53 = vadd.f32 %v585_v33, %v580_v51 }
 0x182   : > { %v591_v54 = vpack.c.bf16 %v588_v53, %v588_v53  ;;  %v590_v55 = vpack.c.bf16 %v587_v52, %v587_v52 }
 0x184   : > { %901 = vmatprep.subr.msk.bf16.mxu1 %vm596_vm10, %v591_v54  ;;  %v598_v56 = vsel %vm596_vm10, %v590_v55, 0 }
 0x185   : > { %618 = vmatpush1.bf16.msra.mxu1 %v598_v56 }
 0x188   : > { %902 = vmatmul.mubr.msk.bf16.vlgmr.msra.gmra.mxu1 %vm592_vm11, %v589_v57 }
 0x189   : > { %803 = vmatprep.mubr.bf16.mxu1 %v948_v0 }
 0x248   : > { %v637_v58 = vpop.f32.mrf.mxu1 }
 0x249   : > { %v644_v60 = vsel %vm405_vm0, %v637_v58, 0.0 }
 0x24a   : > { %v639_v59 = vpop.f32.mrf.mxu1 }
 0x24b   : > { %v645_v61 = vsel %vm405_vm0, %v639_v59, 0.0 }
 0x24c   : > { %v641_v62 = vpop.f32.mrf.mxu1  ;;  %v646_v63 = vadd.f32 %v645_v61, %v644_v60 }
 0x24e   : > { %647 = vadd.xlane.f32.xlu0 %v646_v63  ;;  %v642_v1 = vpop.f32.mrf.mxu1 }
 0x2d7   : > { %v648_v6 = vpop.xlane.xlu0 %647 }
 0x2d8   : > { %v649_v0 = vmul.f32 0.00390625, %v648_v6 }
 0x2da   : > { %v651_v7 = vadd.f32 %v650_v5, %v649_v0 }
 0x2dc   : > { %v652_v8 = vmax.f32 %v651_v7, 0.0 }
 0x2de   : > { %914 = vmatpush3.msk.msra.mxu0 %vm405_vm0, %v652_v8 }
 0x2df   : > { %916 = vmatmul.mubr.msk.f32.vlgmr.msra.gmra.mxu0 %vm655_vm13, %v653_v9 }
 0x39f   : > { %v728_v11 = vpop.f32.mrf.mxu0 }
 0x3a0   : > { %v729_v12 = vadd.f32 %v728_v11, %v654_v10 }
 0x3a1   : > { %v917_v13 = vpop.f32.mrf.mxu0 }
 0x3a2   : > { %v732_v14 = vadd.f32 3.0, %v729_v12 }
 0x3a4   : > { %v733_v15 = vmax.f32 %v732_v14, 0.0 }
 0x3a6   : > { %v734_v16 = vmin.f32 %v733_v15, 6.0 }
 0x3a8   : > { %v735_v17 = vmul.f32 0.16666667, %v734_v16 }
 0x3aa   : > { %738 = vperm.xlu1 %938, %v735_v17  }
 0x3ae   : > { %759 = vperm.xlu1 %938, %v756_v18  }
 0x425   : > { %v739_v19 = vpop.permute.xlu1 %738 }
 0x426   : > { %v741_v20 = vmul.f32 %v739_v19, %v587_v52  ;;  %v742_v21 = vmul.f32 %v739_v19, %v588_v53 }
 0x428   : > { %v743_v22 = vadd.f32 3.0, %v741_v20  ;;  %v744_v23 = vadd.f32 3.0, %v742_v21 }
 0x429   : > { %v760_v37 = vpop.permute.xlu1 %759 }
 0x42a   : > { %v745_v24 = vmax.f32 %v743_v22, 0.0  ;;  %v746_v25 = vmax.f32 %v744_v23, 0.0 }
 0x42c   : > { %v747_v26 = vmin.f32 %v745_v24, 6.0  ;;  %v748_v27 = vmin.f32 %v746_v25, 6.0 }
 0x42e   : > { %v749_v28 = vmul.f32 0.16666667, %v747_v26  ;;  %v750_v29 = vmul.f32 0.16666667, %v748_v27 }
 0x430   : > { %v751_v30 = vmul.f32 %v749_v28, %v741_v20  ;;  %v752_v31 = vmul.f32 %v750_v29, %v742_v21 }
 0x432   : > { %v754_v32 = vpack.c.bf16 %v751_v30, %v751_v30  ;;  %v755_v34 = vpack.c.bf16 %v752_v31, %v752_v31 }
 0x434   : > { %905 = vmatprep.subr.msk.bf16.mxu1 %vm596_vm10, %v755_v34  ;;  %v766_v35 = vsel %vm596_vm10, %v754_v32, 0 }
 0x435   : > { %786 = vmatpush1.bf16.msra.mxu1 %v766_v35 }
 0x438   : > { %906 = vmatmul.mubr.msk.bf16.vlgmr.msra.gmra.mxu1 %vm592_vm11, %v753_v36 }
 0x4f8   : > { %v805_v38 = vpop.f32.mrf.mxu1 }
 0x4f9   : > { %v806_v39 = vadd.f32 %v805_v38, %v760_v37 }
 0x4fa   : > { %v807_v40 = vpop.f32.mrf.mxu1 }
 0x4fb   : > { %v808_v41 = vadd.f32 %v807_v40, %v760_v37  ;;  %v812_v43 = vadd.f32 %v806_v39, %v1042_v2 }
 0x4fc   : > { %v809_v42 = vpop.f32.mrf.mxu1 }
 0x4fd   : > { %v813_v44 = vadd.f32 %v808_v41, %v1046_v3 }
 0x4fe   : > { %v810_v45 = vpop.f32.mrf.mxu1 }
 0x4ff   : > { %v816_v46 = vcombine.low %v812_v43, %v813_v44 }
 0x501   : > { %818 = vst [vmem:[%s386_s23] sm:$0xff] %v816_v46 }
 0x502 PF: > { %s21_s17 = sadd.s32 1, %s946_s17  }
 0x503   : > { %p18_p4 = scmp.ge.s32.totalorder %s21_s17, 4  }
 0x505   :  { %20 = sbr.rel (!%p18_p4) target bundleno = 1 (0x1), region = 102 }

</bundles_post_ra>
